<compile_context>
chip_gen: v6e
topology: v6e:2x2x1
jax: 0.10.0
libtpu: 0.0.40
codegen_flags: <defaults>
</compile_context>

<pallas_src>
import functools

import jax
import jax.numpy as jnp
from jax import lax
from jax.experimental import pallas as pl
from jax.experimental.pallas import tpu as pltpu

_LANE = 128
_SUB = 8


def _round_up(x, m):
    return (x + m - 1) // m * m


def _elu(x):
    # ELU(alpha=1).  exp is evaluated on min(x, 0) so the discarded branch
    # never produces inf (EUP slot, effectively free).
    return jnp.where(x > 0, x, jnp.exp(jnp.minimum(x, 0.0)) - 1.0)


# -----------------------------------------------------------------------------
# Kernel
# -----------------------------------------------------------------------------
def hmr_kernel(n_iter, feat_pad, mid_pad, vec_pad,
               feat_ref, vec_ref, wmid_ref, wvec_ref, bmid_ref, bvec_ref,
               out_ref):
    """One batch-block of the HMR refinement loop.

    feat_ref: (Bb, feat_pad) bf16      vec_ref/out_ref: (Bb, vec_pad) f32 [aliased]
    wmid_ref: (feat_pad + vec_pad + mid_pad, mid_pad) bf16 = [w1_feat; w1_vec; w2]
    wvec_ref: (mid_pad, vec_pad) bf16 = wd
    bmid_ref: (8, mid_pad) f32, rows [b1; b2; 0...]
    bvec_ref: (8, vec_pad) f32, rows [bd; 0...]
    """
    # Ref-views only (no loads yet): each weight tile is loaded at the dot that
    # consumes it, bounding vreg live ranges across the unrolled loop.
    w1_feat = wmid_ref.at[0:feat_pad, :]
    w1_vec = wmid_ref.at[feat_pad:feat_pad + vec_pad, :]
    w2 = wmid_ref.at[feat_pad + vec_pad:feat_pad + vec_pad + mid_pad, :]
    wd = wvec_ref                                   # (mid_pad, vec_pad)

    b1 = bmid_ref[0:1, :]
    b2 = bmid_ref[1:2, :]
    bd = bvec_ref[0:1, :]

    feat = feat_ref[...]                            # bf16
    v0 = vec_ref[...]                               # f32

    # Loop-invariant feature projection, computed once per batch block.
    feat_proj = jnp.dot(feat, w1_feat[...],
                        preferred_element_type=jnp.float32) + b1

    def body(_, v):
        h = _elu(jnp.dot(v.astype(jnp.bfloat16), w1_vec[...],
                         preferred_element_type=jnp.float32) + feat_proj)
        h = _elu(jnp.dot(h.astype(jnp.bfloat16), w2[...],
                         preferred_element_type=jnp.float32) + b2)
        # Dropout: identity (eval mode).
        delta = jnp.dot(h.astype(jnp.bfloat16), wd[...],
                        preferred_element_type=jnp.float32) + bd
        return v + delta

    v = lax.fori_loop(0, n_iter, body, v0, unroll=True)
    out_ref[...] = v


# -----------------------------------------------------------------------------
# Parameter packing (done once, outside the per-call path)
# -----------------------------------------------------------------------------
def pack_params(params, feat_dim, mid_dim, specs_dict):
    """Zero-pad & pack weights (bf16) and biases (f32) into lane-dense slabs."""
    vector_dim = sum(specs_dict.values())
    feat_pad = _round_up(feat_dim, _LANE)
    mid_pad = _round_up(mid_dim, _LANE)
    vec_pad = _round_up(vector_dim, _LANE)

    def pad2(a, rows, cols, dtype):
        a = a.astype(jnp.float32)
        a = jnp.pad(a, ((0, rows - a.shape[0]), (0, cols - a.shape[1])))
        return a.astype(dtype)

    w1 = params["w1"]                       # (feat_dim + vector_dim, mid_dim)
    w1_feat, w1_vec = w1[:feat_dim], w1[feat_dim:]

    # bf16 weight slabs, each at its own natural column width (no dead lanes).
    w_mid = jnp.concatenate([
        pad2(w1_feat, feat_pad, mid_pad, jnp.bfloat16),
        pad2(w1_vec, vec_pad, mid_pad, jnp.bfloat16),
        pad2(params["w2"], mid_pad, mid_pad, jnp.bfloat16),
    ], axis=0)
    w_vec = pad2(params["wd"], mid_pad, vec_pad, jnp.bfloat16)

    # Biases stay f32: negligible footprint, added to the f32 accumulator.
    b_mid = jnp.concatenate([
        pad2(params["b1"], 1, mid_pad, jnp.float32),
        pad2(params["b2"], 1, mid_pad, jnp.float32),
        jnp.zeros((_SUB - 2, mid_pad), jnp.float32),
    ], axis=0)
    b_vec = jnp.concatenate([
        pad2(params["bd"], 1, vec_pad, jnp.float32),
        jnp.zeros((_SUB - 1, vec_pad), jnp.float32),
    ], axis=0)

    dims = dict(feat_pad=feat_pad, mid_pad=mid_pad, vec_pad=vec_pad)
    return (w_mid, w_vec, b_mid, b_vec), dims


# -----------------------------------------------------------------------------
# Jitted forward: pad/pack -> pallas_call -> packed padded output
# -----------------------------------------------------------------------------
@functools.partial(
    jax.jit, static_argnames=("n_iter", "feat_pad", "mid_pad", "vec_pad"))
def _hmr_forward(feat, vecs, w_mid, w_vec, b_mid, b_vec, *,
                 n_iter, feat_pad, mid_pad, vec_pad):
    B, feat_dim = feat.shape
    vector_dim = sum(v.shape[1] for v in vecs)

    # Batch blocking: >=2 blocks once B >= 16 (v7x two-TC sharding via the
    # "parallel" grid axis), up to 512-row blocks for large batches (v6e).
    b_pad8 = _round_up(max(B, 1), _SUB)
    block_b = min(512, _round_up((b_pad8 + 1) // 2, _SUB))
    B_total = _round_up(max(B, block_b), block_b)

    # Minimal wrapper-side HBM traffic: one pad (fused with the bf16 cast) for
    # feat, one concatenate (vectors + zero pad) for the init vector.
    feat_p = jnp.pad(feat.astype(jnp.bfloat16),
                     ((0, B_total - B), (0, feat_pad - feat_dim)))
    parts = [v.astype(jnp.float32) for v in vecs]
    if vec_pad > vector_dim:
        parts.append(jnp.zeros((B, vec_pad - vector_dim), jnp.float32))
    vec_p = jnp.concatenate(parts, axis=1)
    if B_total > B:
        vec_p = jnp.pad(vec_p, ((0, B_total - B), (0, 0)))

    grid = (B_total // block_b,)
    kernel = functools.partial(hmr_kernel, n_iter, feat_pad, mid_pad, vec_pad)

    # Parameter slabs: whole-array VMEM residents (single-buffered; their block
    # index never changes, so no double-buffered copy of the weights).
    resident = pl.BlockSpec(memory_space=pltpu.MemorySpace.VMEM)

    out = pl.pallas_call(
        kernel,
        out_shape=jax.ShapeDtypeStruct((B_total, vec_pad), jnp.float32),
        grid=grid,
        in_specs=[
            pl.BlockSpec((block_b, feat_pad), lambda i: (i, 0)),
            pl.BlockSpec((block_b, vec_pad), lambda i: (i, 0)),
            resident,   # w_mid
            resident,   # w_vec
            resident,   # b_mid
            resident,   # b_vec
        ],
        out_specs=pl.BlockSpec((block_b, vec_pad), lambda i: (i, 0)),
        input_output_aliases={1: 0},   # init-vector buffer reused as output
        compiler_params=pltpu.CompilerParams(
            dimension_semantics=("parallel",),
            vmem_limit_bytes=64 * 1024 * 1024),
    )(feat_p, vec_p, w_mid, w_vec, b_mid, b_vec)
    return out   # (B_total, vec_pad), padded & packed


def hmr_layer_forward(feat, init_vector_dict, packed, dims, specs_dict, n_iter):
    """Wrapper mirroring HMRLayer.forward (eval mode)."""
    keys = tuple(specs_dict.keys())
    vecs = tuple(init_vector_dict[k] for k in keys)
    w_mid, w_vec, b_mid, b_vec = packed
    out = _hmr_forward(feat, vecs, w_mid, w_vec, b_mid, b_vec,
                       n_iter=int(n_iter), **dims)
    B = feat.shape[0]
    preds, off = {}, 0
    for k in keys:
        s = int(specs_dict[k])
        preds[k] = out[:B, off:off + s]   # lazy per-key slices of packed output
        off += s
    # TODO(synk): pred_vector_dict.has_invalid() is a method of a custom dict
    # class in the original repo (a debug validity check); omitted here.
    return preds


# -----------------------------------------------------------------------------
# Synthetic parameter init (shapes match the PyTorch module)
# -----------------------------------------------------------------------------
def init_params(key, feat_dim, mid_dim, specs_dict):
    vector_dim = sum(specs_dict.values())
    hmr_dim = feat_dim + vector_dim
    k1, k2, k3, k4, k5 = jax.random.split(key, 5)

    def uniform_fan(k, shape, fan_in):
        bound = 1.0 / jnp.sqrt(fan_in)
        return jax.random.uniform(k, shape, jnp.float32, -bound, bound)

    # refine Linear 1 (hmr_dim -> mid_dim), stored transposed (in, out)
    w1 = uniform_fan(k1, (hmr_dim, mid_dim), hmr_dim)
    b1 = uniform_fan(k2, (1, mid_dim), hmr_dim)
    # refine Linear 2 (mid_dim -> mid_dim)
    w2 = uniform_fan(k3, (mid_dim, mid_dim), mid_dim)
    b2 = uniform_fan(k4, (1, mid_dim), mid_dim)

    # decoders: xavier_uniform gain=0.01, fused column-wise into (mid, vector_dim)
    wds, bds = [], []
    dk = k5
    for _, vec_size in specs_dict.items():
        dk, ka, kb = jax.random.split(dk, 3)
        limit = 0.01 * jnp.sqrt(6.0 / (mid_dim + vec_size))
        wds.append(jax.random.uniform(ka, (mid_dim, vec_size), jnp.float32,
                                      -limit, limit))
        bds.append(uniform_fan(kb, (1, vec_size), mid_dim))
    wd = jnp.concatenate(wds, axis=1)
    bd = jnp.concatenate(bds, axis=1)

    return dict(w1=w1, b1=b1, w2=w2, b2=b2, wd=wd, bd=bd)


# -----------------------------------------------------------------------------
# Pure-JAX references
# -----------------------------------------------------------------------------
def _reference_forward_f32(feat, init_vector_dict, params, specs_dict, n_iter):
    """Faithful f32 mirror of the PyTorch forward (eval mode)."""
    keys = list(specs_dict.keys())
    v = jnp.concatenate([init_vector_dict[k] for k in keys], axis=1)
    for _ in range(n_iter):
        xc = jnp.concatenate([feat, v], axis=1)
        h = _elu(xc @ params["w1"] + params["b1"])
        h = _elu(h @ params["w2"] + params["b2"])
        v = v + (h @ params["wd"] + params["bd"])
    out, off = {}, 0
    for k in keys:
        s = specs_dict[k]
        out[k] = v[:, off:off + s]
        off += s
    return out


def _reference_forward_bf16(feat, init_vector_dict, params, specs_dict, n_iter):
    """Mirrors the kernel's bf16 quantization points (tight correctness check)."""
    q = lambda x: x.astype(jnp.bfloat16).astype(jnp.float32)
    keys = list(specs_dict.keys())
    feat_dim = feat.shape[1]
    w1 = q(params["w1"])
    w1_feat, w1_vec = w1[:feat_dim], w1[feat_dim:]
    w2, wd = q(params["w2"]), q(params["wd"])
    v = jnp.concatenate([init_vector_dict[k] for k in keys], axis=1)
    feat_proj = q(feat) @ w1_feat + params["b1"]
    for _ in range(n_iter):
        h = _elu(q(v) @ w1_vec + feat_proj)
        h = _elu(q(h) @ w2 + params["b2"])
        v = v + (q(h) @ wd + params["bd"])
    out, off = {}, 0
    for k in keys:
        s = specs_dict[k]
        out[k] = v[:, off:off + s]
        off += s
    return out


if __name__ == "__main__":
    B = 8
    feat_dim = 32
    mid_dim = 32
    specs_dict = {"pose": 12, "shape": 10, "cam": 3}
    n_iter = 3

    key = jax.random.PRNGKey(0)
    kf, kv, kp = jax.random.split(key, 3)

    feat = jax.random.normal(kf, (B, feat_dim), jnp.float32)
    init_vectors = {}
    vk = kv
    for name, sz in specs_dict.items():
        vk, sub = jax.random.split(vk)
        init_vectors[name] = jax.random.normal(sub, (B, sz), jnp.float32) * 0.1

    params = init_params(kp, feat_dim, mid_dim, specs_dict)
    packed, dims = pack_params(params, feat_dim, mid_dim, specs_dict)

    pred = hmr_layer_forward(feat, init_vectors, packed, dims, specs_dict, n_iter)
    pred = jax.tree_util.tree_map(jax.block_until_ready, pred)

    ref_q = _reference_forward_bf16(feat, init_vectors, params, specs_dict, n_iter)
    ref_f = _reference_forward_f32(feat, init_vectors, params, specs_dict, n_iter)
    for k in specs_dict:
        assert pred[k].shape == (B, specs_dict[k])
        # Tight check vs. a reference using the same bf16 quantization points.
        assert jnp.allclose(pred[k], ref_q[k], atol=1e-4, rtol=1e-4), k
        # Loose check vs. the pure-f32 module semantics (bf16 weight drift).
        assert jnp.allclose(pred[k], ref_f[k], atol=1e-2, rtol=1e-2), k

    print("KERNEL_OK")
</pallas_src>

<mosaic_0001>
module attributes {stable_mosaic.version = 11 : i64} {
  func.func @hmr_kernel(%arg0: i32, %arg1: memref<8x128xbf16, #tpu.memory_space<vmem>>, %arg2: memref<8x128xf32, #tpu.memory_space<vmem>>, %arg3: memref<384x128xbf16, #tpu.memory_space<vmem>>, %arg4: memref<128x128xbf16, #tpu.memory_space<vmem>>, %arg5: memref<8x128xf32, #tpu.memory_space<vmem>>, %arg6: memref<8x128xf32, #tpu.memory_space<vmem>>, %arg7: memref<8x128xf32, #tpu.memory_space<vmem>>) attributes {dimension_semantics = [#tpu.dimension_semantics<parallel>], iteration_bounds = array<i64: 1>, scalar_prefetch = 0 : i64, scratch_operands = 0 : i64, tpu.core_type = #tpu.core_type<tc>, window_params = [{transform_indices = @transform_0, window_bounds = array<i64: 8, 128>}, {transform_indices = @transform_1, window_bounds = array<i64: 8, 128>}, {pipeline_mode = #tpu.pipeline_mode<synchronous>, transform_indices = @transform_2, window_bounds = array<i64: 384, 128>}, {pipeline_mode = #tpu.pipeline_mode<synchronous>, transform_indices = @transform_3, window_bounds = array<i64: 128, 128>}, {pipeline_mode = #tpu.pipeline_mode<synchronous>, transform_indices = @transform_4, window_bounds = array<i64: 8, 128>}, {pipeline_mode = #tpu.pipeline_mode<synchronous>, transform_indices = @transform_5, window_bounds = array<i64: 8, 128>}, {transform_indices = @transform_6, window_bounds = array<i64: 8, 128>}]} {
    %c0 = arith.constant 0 : index
    %c0_0 = arith.constant 0 : index
    %0 = vector.load %arg5[%c0, %c0_0] : memref<8x128xf32, #tpu.memory_space<vmem>>, vector<1x128xf32>
    %c1 = arith.constant 1 : index
    %c0_1 = arith.constant 0 : index
    %1 = vector.load %arg5[%c1, %c0_1] : memref<8x128xf32, #tpu.memory_space<vmem>>, vector<1x128xf32>
    %c0_2 = arith.constant 0 : index
    %c0_3 = arith.constant 0 : index
    %2 = vector.load %arg6[%c0_2, %c0_3] : memref<8x128xf32, #tpu.memory_space<vmem>>, vector<1x128xf32>
    %c0_4 = arith.constant 0 : index
    %c0_5 = arith.constant 0 : index
    %3 = vector.load %arg1[%c0_4, %c0_5] : memref<8x128xbf16, #tpu.memory_space<vmem>>, vector<8x128xbf16>
    %c0_6 = arith.constant 0 : index
    %c0_7 = arith.constant 0 : index
    %4 = vector.load %arg2[%c0_6, %c0_7] : memref<8x128xf32, #tpu.memory_space<vmem>>, vector<8x128xf32>
    %c0_8 = arith.constant 0 : index
    %c0_9 = arith.constant 0 : index
    %5 = vector.load %arg3[%c0_8, %c0_9] : memref<384x128xbf16, #tpu.memory_space<vmem>>, vector<128x128xbf16>
    %cst = arith.constant dense<0.000000e+00> : vector<8x128xf32>
    %6 = tpu.matmul %3, %5, %cst {dimension_numbers = #tpu.dot_dimension_numbers<[1], [0], [0], [1], [0, 0, 1, 1], [], []>} : vector<8x128xbf16>, vector<128x128xbf16>, vector<8x128xf32> -> vector<8x128xf32>
    %7 = vector.broadcast %0 : vector<1x128xf32> to vector<8x128xf32>
    %8 = arith.addf %6, %7 : vector<8x128xf32>
    %c0_i32 = arith.constant 0 : i32
    %9 = arith.truncf %4 : vector<8x128xf32> to vector<8x128xbf16>
    %c128 = arith.constant 128 : index
    %c0_10 = arith.constant 0 : index
    %10 = vector.load %arg3[%c128, %c0_10] : memref<384x128xbf16, #tpu.memory_space<vmem>>, vector<128x128xbf16>
    %cst_11 = arith.constant dense<0.000000e+00> : vector<8x128xf32>
    %11 = tpu.matmul %9, %10, %cst_11 {dimension_numbers = #tpu.dot_dimension_numbers<[1], [0], [0], [1], [0, 0, 1, 1], [], []>} : vector<8x128xbf16>, vector<128x128xbf16>, vector<8x128xf32> -> vector<8x128xf32>
    %12 = arith.addf %11, %8 : vector<8x128xf32>
    %cst_12 = arith.constant 0.000000e+00 : f32
    %13 = vector.broadcast %cst_12 : f32 to vector<8x128xf32>
    %14 = arith.cmpf ogt, %12, %13 : vector<8x128xf32>
    %cst_13 = arith.constant 0.000000e+00 : f32
    %15 = vector.broadcast %cst_13 : f32 to vector<8x128xf32>
    %16 = arith.minimumf %12, %15 : vector<8x128xf32>
    %17 = math.exp %16 : vector<8x128xf32>
    %cst_14 = arith.constant 1.000000e+00 : f32
    %18 = vector.broadcast %cst_14 : f32 to vector<8x128xf32>
    %19 = arith.subf %17, %18 : vector<8x128xf32>
    %20 = arith.select %14, %12, %19 : vector<8x128xi1>, vector<8x128xf32>
    %21 = arith.truncf %20 : vector<8x128xf32> to vector<8x128xbf16>
    %c256 = arith.constant 256 : index
    %c0_15 = arith.constant 0 : index
    %22 = vector.load %arg3[%c256, %c0_15] : memref<384x128xbf16, #tpu.memory_space<vmem>>, vector<128x128xbf16>
    %cst_16 = arith.constant dense<0.000000e+00> : vector<8x128xf32>
    %23 = tpu.matmul %21, %22, %cst_16 {dimension_numbers = #tpu.dot_dimension_numbers<[1], [0], [0], [1], [0, 0, 1, 1], [], []>} : vector<8x128xbf16>, vector<128x128xbf16>, vector<8x128xf32> -> vector<8x128xf32>
    %24 = vector.broadcast %1 : vector<1x128xf32> to vector<8x128xf32>
    %25 = arith.addf %23, %24 : vector<8x128xf32>
    %cst_17 = arith.constant 0.000000e+00 : f32
    %26 = vector.broadcast %cst_17 : f32 to vector<8x128xf32>
    %27 = arith.cmpf ogt, %25, %26 : vector<8x128xf32>
    %cst_18 = arith.constant 0.000000e+00 : f32
    %28 = vector.broadcast %cst_18 : f32 to vector<8x128xf32>
    %29 = arith.minimumf %25, %28 : vector<8x128xf32>
    %30 = math.exp %29 : vector<8x128xf32>
    %cst_19 = arith.constant 1.000000e+00 : f32
    %31 = vector.broadcast %cst_19 : f32 to vector<8x128xf32>
    %32 = arith.subf %30, %31 : vector<8x128xf32>
    %33 = arith.select %27, %25, %32 : vector<8x128xi1>, vector<8x128xf32>
    %34 = arith.truncf %33 : vector<8x128xf32> to vector<8x128xbf16>
    %c0_20 = arith.constant 0 : index
    %c0_21 = arith.constant 0 : index
    %35 = vector.load %arg4[%c0_20, %c0_21] : memref<128x128xbf16, #tpu.memory_space<vmem>>, vector<128x128xbf16>
    %cst_22 = arith.constant dense<0.000000e+00> : vector<8x128xf32>
    %36 = tpu.matmul %34, %35, %cst_22 {dimension_numbers = #tpu.dot_dimension_numbers<[1], [0], [0], [1], [0, 0, 1, 1], [], []>} : vector<8x128xbf16>, vector<128x128xbf16>, vector<8x128xf32> -> vector<8x128xf32>
    %37 = vector.broadcast %2 : vector<1x128xf32> to vector<8x128xf32>
    %38 = arith.addf %36, %37 : vector<8x128xf32>
    %39 = arith.addf %4, %38 : vector<8x128xf32>
    %c1_i32 = arith.constant 1 : i32
    %40 = arith.truncf %39 : vector<8x128xf32> to vector<8x128xbf16>
    %c128_23 = arith.constant 128 : index
    %c0_24 = arith.constant 0 : index
    %41 = vector.load %arg3[%c128_23, %c0_24] : memref<384x128xbf16, #tpu.memory_space<vmem>>, vector<128x128xbf16>
    %cst_25 = arith.constant dense<0.000000e+00> : vector<8x128xf32>
    %42 = tpu.matmul %40, %41, %cst_25 {dimension_numbers = #tpu.dot_dimension_numbers<[1], [0], [0], [1], [0, 0, 1, 1], [], []>} : vector<8x128xbf16>, vector<128x128xbf16>, vector<8x128xf32> -> vector<8x128xf32>
    %43 = arith.addf %42, %8 : vector<8x128xf32>
    %cst_26 = arith.constant 0.000000e+00 : f32
    %44 = vector.broadcast %cst_26 : f32 to vector<8x128xf32>
    %45 = arith.cmpf ogt, %43, %44 : vector<8x128xf32>
    %cst_27 = arith.constant 0.000000e+00 : f32
    %46 = vector.broadcast %cst_27 : f32 to vector<8x128xf32>
    %47 = arith.minimumf %43, %46 : vector<8x128xf32>
    %48 = math.exp %47 : vector<8x128xf32>
    %cst_28 = arith.constant 1.000000e+00 : f32
    %49 = vector.broadcast %cst_28 : f32 to vector<8x128xf32>
    %50 = arith.subf %48, %49 : vector<8x128xf32>
    %51 = arith.select %45, %43, %50 : vector<8x128xi1>, vector<8x128xf32>
    %52 = arith.truncf %51 : vector<8x128xf32> to vector<8x128xbf16>
    %c256_29 = arith.constant 256 : index
    %c0_30 = arith.constant 0 : index
    %53 = vector.load %arg3[%c256_29, %c0_30] : memref<384x128xbf16, #tpu.memory_space<vmem>>, vector<128x128xbf16>
    %cst_31 = arith.constant dense<0.000000e+00> : vector<8x128xf32>
    %54 = tpu.matmul %52, %53, %cst_31 {dimension_numbers = #tpu.dot_dimension_numbers<[1], [0], [0], [1], [0, 0, 1, 1], [], []>} : vector<8x128xbf16>, vector<128x128xbf16>, vector<8x128xf32> -> vector<8x128xf32>
    %55 = vector.broadcast %1 : vector<1x128xf32> to vector<8x128xf32>
    %56 = arith.addf %54, %55 : vector<8x128xf32>
    %cst_32 = arith.constant 0.000000e+00 : f32
    %57 = vector.broadcast %cst_32 : f32 to vector<8x128xf32>
    %58 = arith.cmpf ogt, %56, %57 : vector<8x128xf32>
    %cst_33 = arith.constant 0.000000e+00 : f32
    %59 = vector.broadcast %cst_33 : f32 to vector<8x128xf32>
    %60 = arith.minimumf %56, %59 : vector<8x128xf32>
    %61 = math.exp %60 : vector<8x128xf32>
    %cst_34 = arith.constant 1.000000e+00 : f32
    %62 = vector.broadcast %cst_34 : f32 to vector<8x128xf32>
    %63 = arith.subf %61, %62 : vector<8x128xf32>
    %64 = arith.select %58, %56, %63 : vector<8x128xi1>, vector<8x128xf32>
    %65 = arith.truncf %64 : vector<8x128xf32> to vector<8x128xbf16>
    %c0_35 = arith.constant 0 : index
    %c0_36 = arith.constant 0 : index
    %66 = vector.load %arg4[%c0_35, %c0_36] : memref<128x128xbf16, #tpu.memory_space<vmem>>, vector<128x128xbf16>
    %cst_37 = arith.constant dense<0.000000e+00> : vector<8x128xf32>
    %67 = tpu.matmul %65, %66, %cst_37 {dimension_numbers = #tpu.dot_dimension_numbers<[1], [0], [0], [1], [0, 0, 1, 1], [], []>} : vector<8x128xbf16>, vector<128x128xbf16>, vector<8x128xf32> -> vector<8x128xf32>
    %68 = vector.broadcast %2 : vector<1x128xf32> to vector<8x128xf32>
    %69 = arith.addf %67, %68 : vector<8x128xf32>
    %70 = arith.addf %39, %69 : vector<8x128xf32>
    %c2_i32 = arith.constant 2 : i32
    %71 = arith.truncf %70 : vector<8x128xf32> to vector<8x128xbf16>
    %c128_38 = arith.constant 128 : index
    %c0_39 = arith.constant 0 : index
    %72 = vector.load %arg3[%c128_38, %c0_39] : memref<384x128xbf16, #tpu.memory_space<vmem>>, vector<128x128xbf16>
    %cst_40 = arith.constant dense<0.000000e+00> : vector<8x128xf32>
    %73 = tpu.matmul %71, %72, %cst_40 {dimension_numbers = #tpu.dot_dimension_numbers<[1], [0], [0], [1], [0, 0, 1, 1], [], []>} : vector<8x128xbf16>, vector<128x128xbf16>, vector<8x128xf32> -> vector<8x128xf32>
    %74 = arith.addf %73, %8 : vector<8x128xf32>
    %cst_41 = arith.constant 0.000000e+00 : f32
    %75 = vector.broadcast %cst_41 : f32 to vector<8x128xf32>
    %76 = arith.cmpf ogt, %74, %75 : vector<8x128xf32>
    %cst_42 = arith.constant 0.000000e+00 : f32
    %77 = vector.broadcast %cst_42 : f32 to vector<8x128xf32>
    %78 = arith.minimumf %74, %77 : vector<8x128xf32>
    %79 = math.exp %78 : vector<8x128xf32>
    %cst_43 = arith.constant 1.000000e+00 : f32
    %80 = vector.broadcast %cst_43 : f32 to vector<8x128xf32>
    %81 = arith.subf %79, %80 : vector<8x128xf32>
    %82 = arith.select %76, %74, %81 : vector<8x128xi1>, vector<8x128xf32>
    %83 = arith.truncf %82 : vector<8x128xf32> to vector<8x128xbf16>
    %c256_44 = arith.constant 256 : index
    %c0_45 = arith.constant 0 : index
    %84 = vector.load %arg3[%c256_44, %c0_45] : memref<384x128xbf16, #tpu.memory_space<vmem>>, vector<128x128xbf16>
    %cst_46 = arith.constant dense<0.000000e+00> : vector<8x128xf32>
    %85 = tpu.matmul %83, %84, %cst_46 {dimension_numbers = #tpu.dot_dimension_numbers<[1], [0], [0], [1], [0, 0, 1, 1], [], []>} : vector<8x128xbf16>, vector<128x128xbf16>, vector<8x128xf32> -> vector<8x128xf32>
    %86 = vector.broadcast %1 : vector<1x128xf32> to vector<8x128xf32>
    %87 = arith.addf %85, %86 : vector<8x128xf32>
    %cst_47 = arith.constant 0.000000e+00 : f32
    %88 = vector.broadcast %cst_47 : f32 to vector<8x128xf32>
    %89 = arith.cmpf ogt, %87, %88 : vector<8x128xf32>
    %cst_48 = arith.constant 0.000000e+00 : f32
    %90 = vector.broadcast %cst_48 : f32 to vector<8x128xf32>
    %91 = arith.minimumf %87, %90 : vector<8x128xf32>
    %92 = math.exp %91 : vector<8x128xf32>
    %cst_49 = arith.constant 1.000000e+00 : f32
    %93 = vector.broadcast %cst_49 : f32 to vector<8x128xf32>
    %94 = arith.subf %92, %93 : vector<8x128xf32>
    %95 = arith.select %89, %87, %94 : vector<8x128xi1>, vector<8x128xf32>
    %96 = arith.truncf %95 : vector<8x128xf32> to vector<8x128xbf16>
    %c0_50 = arith.constant 0 : index
    %c0_51 = arith.constant 0 : index
    %97 = vector.load %arg4[%c0_50, %c0_51] : memref<128x128xbf16, #tpu.memory_space<vmem>>, vector<128x128xbf16>
    %cst_52 = arith.constant dense<0.000000e+00> : vector<8x128xf32>
    %98 = tpu.matmul %96, %97, %cst_52 {dimension_numbers = #tpu.dot_dimension_numbers<[1], [0], [0], [1], [0, 0, 1, 1], [], []>} : vector<8x128xbf16>, vector<128x128xbf16>, vector<8x128xf32> -> vector<8x128xf32>
    %99 = vector.broadcast %2 : vector<1x128xf32> to vector<8x128xf32>
    %100 = arith.addf %98, %99 : vector<8x128xf32>
    %101 = arith.addf %70, %100 : vector<8x128xf32>
    %c0_53 = arith.constant 0 : index
    %c0_54 = arith.constant 0 : index
    %102 = vector.load %arg7[%c0_53, %c0_54] : memref<8x128xf32, #tpu.memory_space<vmem>>, vector<8x128xf32>
    tpu.vector_store %arg7[%c0_53, %c0_54], %101 {strides = array<i32>} : memref<8x128xf32, #tpu.memory_space<vmem>>, vector<8x128xf32>,
    return
  }
  func.func @transform_0(%arg0: i32) -> (i32, i32) {
    %c0_i32 = arith.constant 0 : i32
    %c0_i32_0 = arith.constant 0 : i32
    return %arg0, %c0_i32 : i32, i32
  }
  func.func @transform_1(%arg0: i32) -> (i32, i32) {
    %c0_i32 = arith.constant 0 : i32
    %c0_i32_0 = arith.constant 0 : i32
    return %arg0, %c0_i32 : i32, i32
  }
  func.func @transform_2(%arg0: i32) -> (i32, i32) {
    %c0_i32 = arith.constant 0 : i32
    %c0_i32_0 = arith.constant 0 : i32
    %c0_i32_1 = arith.constant 0 : i32
    return %c0_i32, %c0_i32_0 : i32, i32
  }
  func.func @transform_3(%arg0: i32) -> (i32, i32) {
    %c0_i32 = arith.constant 0 : i32
    %c0_i32_0 = arith.constant 0 : i32
    %c0_i32_1 = arith.constant 0 : i32
    return %c0_i32, %c0_i32_0 : i32, i32
  }
  func.func @transform_4(%arg0: i32) -> (i32, i32) {
    %c0_i32 = arith.constant 0 : i32
    %c0_i32_0 = arith.constant 0 : i32
    %c0_i32_1 = arith.constant 0 : i32
    return %c0_i32, %c0_i32_0 : i32, i32
  }
  func.func @transform_5(%arg0: i32) -> (i32, i32) {
    %c0_i32 = arith.constant 0 : i32
    %c0_i32_0 = arith.constant 0 : i32
    %c0_i32_1 = arith.constant 0 : i32
    return %c0_i32, %c0_i32_0 : i32, i32
  }
  func.func @transform_6(%arg0: i32) -> (i32, i32) {
    %c0_i32 = arith.constant 0 : i32
    %c0_i32_0 = arith.constant 0 : i32
    return %arg0, %c0_i32 : i32, i32
  }
}

</mosaic_0001>

<bundles_post_ra>
// kernel: _hmr_forward.1
= control target key start
LH: loop header
LB: loop body
LE: loop exit
PB: predicated region body
PF: predicated region fallthrough
CT: control target
= control target key end

     0   :  { %11 = vsyncpa [#allocation3], 0  ;;  %s1636_s0 = inlined_call_operand.vmem [shape: bf16[8,128], index: 0, kind: input, shape index: {}]   ;;  %s1637_s1 = inlined_call_operand.hbm [shape: f32[8,128], index: 1, kind: input, shape index: {}, may-alias: {1,6}]   ;;  %s1638_s2 = inlined_call_operand.hbm [shape: bf16[384,128], index: 2, kind: input, shape index: {}]   ;;  %s1639_s3 = inlined_call_operand.vmem [shape: bf16[128,128], index: 3, kind: input, shape index: {}]   ;;  %s1640_s4 = inlined_call_operand.hbm [shape: f32[8,128], index: 4, kind: input, shape index: {}]   ;;  %s1641_s5 = inlined_call_operand.hbm [shape: f32[8,128], index: 5, kind: input, shape index: {}]   ;;  %s1642_s6 = inlined_call_operand.hbm [shape: f32[8,128], index: 6, kind: output, shape index: {}, may-alias: {1,6}]  }
   0x1   :  { %12 = vsyncpa [#allocation6], 0 }
   0x2   :  { %13 = vsyncpa [#allocation9], 0 }
   0x3   :  { %14 = vsyncpa [#allocation4], 0  ;;  %s1305_s21 = smov [#allocation5]  }
   0x4   :  { %s32_s22 = sshll.u32 %s1305_s21, 4  ;;  %s33_s22 = int_to_ptr.vmem [resolvable:$true] %s32_s22 }
   0x5   :  { %s1205_s23 = scalar_lea.vmem %s33_s22, 3072  ;;  %p1210_p1 = scmp.lt.s32.totalorder %s33_s22, %s33_s22 }
   0x6   :  { %p1206_p0 = scmp.ne.s32.totalorder %s33_s22, %s1205_s23  ;;  %p1211_p2 = scmp.lt.s32.totalorder %s1205_s23, %s1205_s23 }
   0x8   :  { %p1212_p3 = por %p1211_p2, %p1210_p1 }
   0xa   :  { %p1213_p4 = pnand %p1212_p3, %p1206_p0 }
   0xc   :  { %1216 = shalt.err (!%p1213_p4)
}
   0xd   :  { %s1306_s24 = smov 64   ;;  %s1307_s25 = smov 4  }
   0xe   :  { %38 = dma.hbm_to_vmem [thread:$0]  %s1638_s2, 3072, %s33_s22, [#allocation6], %s1306_s24, %s1306_s24, %s1307_s25  }
   0xf   :  { %s1308_s28 = smov [#allocation2]   ;;  %s1309_s30 = smov [#allocation7]  }
  0x10   :  { %s23_s29 = sshll.u32 %s1308_s28, 4  ;;  %s47_s7 = sshll.u32 %s1309_s30, 4  ;;  %s24_s29 = int_to_ptr.vmem [resolvable:$true] %s23_s29  ;;  %s48_s7 = int_to_ptr.vmem [resolvable:$true] %s47_s7 }
  0x11   :  { %s1225_s8 = scalar_lea.vmem %s24_s29, 128  ;;  %p1230_p6 = scmp.lt.s32.totalorder %s24_s29, %s24_s29 }
  0x12   :  { %p1226_p5 = scmp.ne.s32.totalorder %s24_s29, %s1225_s8  ;;  %p1231_p7 = scmp.lt.s32.totalorder %s1225_s8, %s1225_s8 }
  0x14   :  { %p1232_p8 = por %p1231_p7, %p1230_p6 }
  0x16   :  { %p1233_p9 = pnand %p1232_p8, %p1226_p5 }
  0x18   :  { %1236 = shalt.err (!%p1233_p9)
}
  0x19   :  { %26 = dma.hbm_to_vmem [thread:$0]  %s1637_s1, 128, %s24_s29, [#allocation3]  }
  0x1a   :  { %s1245_s11 = scalar_lea.vmem %s48_s7, 128  ;;  %p1250_p11 = scmp.lt.s32.totalorder %s48_s7, %s48_s7 }
  0x1b   :  { %p1246_p10 = scmp.ne.s32.totalorder %s48_s7, %s1245_s11  ;;  %p1251_p12 = scmp.lt.s32.totalorder %s1245_s11, %s1245_s11 }
  0x1d   :  { %p1252_p13 = por %p1251_p12, %p1250_p11 }
  0x1f   :  { %p1253_p0 = pnand %p1252_p13, %p1246_p10 }
  0x21   :  { %1256 = shalt.err (!%p1253_p0)
}
  0x22   :  { %50 = dma.hbm_to_vmem [thread:$0]  %s1640_s4, 128, %s48_s7, [#allocation6]  }
  0x23   :  { %s1310_s13 = smov [#allocation8]  }
  0x24   :  { %s57_s14 = sshll.u32 %s1310_s13, 4  ;;  %s58_s14 = int_to_ptr.vmem [resolvable:$true] %s57_s14 }
  0x25   :  { %s1265_s15 = scalar_lea.vmem %s58_s14, 128  ;;  %p1270_p2 = scmp.lt.s32.totalorder %s58_s14, %s58_s14 }
  0x26   :  { %p1266_p1 = scmp.ne.s32.totalorder %s58_s14, %s1265_s15  ;;  %p1271_p3 = scmp.lt.s32.totalorder %s1265_s15, %s1265_s15 }
  0x28   :  { %p1272_p4 = por %p1271_p3, %p1270_p2 }
  0x2a   :  { %p1273_p5 = pnand %p1272_p4, %p1266_p1 }
  0x2c   :  { %1276 = shalt.err (!%p1273_p5)
}
  0x2d   :  { %60 = dma.hbm_to_vmem [thread:$0]  %s1641_s5, 128, %s58_s14, [#allocation9]  }
  0x2e   :  { %1297 = dma.done.wait [#allocation3], 128  }
  0x2f   :  { %1298 = vsyncadd [#allocation3], 4294967168 }
  0x30   :  { %1299 = dma.done.wait [#allocation6], 3200  }
  0x31   :  { %1300 = vsyncadd [#allocation6], 4294964096 }
  0x32   :  { %1301 = dma.done.wait [#allocation9], 128  }
  0x33   :  { %1302 = vsyncadd [#allocation9], 4294967168  ;;  %v1311_v0 = vmov 0.0   ;;  %vm1312_vm0 = vmmov 0   ;;  %v1153_v1 = vld [vmem:[#allocation5 + $0x38] sm:$0xff]   ;;  %v1155_v3 = vld [vmem:[#allocation5 + $0x30] sm:$0xff]  }
  0x34   :  { %944 = vmatprep.subr.bf16.mxu0 %v1311_v0  ;;  %964 = vmatprep.subr.bf16.mxu1 %v1311_v0  ;;  %v1367_v2 = vld [vmem:[#allocation5 + $0x78] sm:$0xff]   ;;  %v1371_v4 = vld [vmem:[#allocation5 + $0x70] sm:$0xff]   ;;  %v1157_v5 = vld [vmem:[#allocation5 + $0x28] sm:$0xff]  }
  0x35   :  { %960 = vmatprep.mubr.msk.bf16.mxu0 %vm1312_vm0, %v1311_v0  ;;  %980 = vmatprep.mubr.msk.bf16.mxu1 %vm1312_vm0, %v1311_v0  ;;  %v1376_v6 = vld [vmem:[#allocation5 + $0x68] sm:$0xff]   ;;  %v1159_v7 = vld [vmem:[#allocation5 + $0x20] sm:$0xff]   ;;  %v1161_v9 = vld [vmem:[#allocation5 + $0x18] sm:$0xff]  }
  0x36   :  { %945 = vmatpush3.bf16.msra.mxu0 %v1153_v1  ;;  %965 = vmatpush3.bf16.msra.mxu1 %v1367_v2  ;;  %v1381_v8 = vld [vmem:[#allocation5 + $0x60] sm:$0xff]   ;;  %v1386_v10 = vld [vmem:[#allocation5 + $0x58] sm:$0xff]   ;;  %v1163_v11 = vld [vmem:[#allocation5 + $0x10] sm:$0xff]  }
  0x37   :  { %946 = vmatprep.subr.bf16.mxu0 %v1311_v0  ;;  %966 = vmatprep.subr.bf16.mxu1 %v1311_v0  ;;  %v1389_v12 = vld [vmem:[#allocation5 + $0x50] sm:$0xff]   ;;  %v1165_v13 = vld [vmem:[#allocation5 + $0x8] sm:$0xff]   ;;  %v1167_v15 = vld [vmem:[#allocation5] sm:$0xff]  }
  0x38   :  { %v1394_v14 = vld [vmem:[#allocation5 + $0x48] sm:$0xff]   ;;  %v1399_v16 = vld [vmem:[#allocation5 + $0x40] sm:$0xff]   ;;  %v1401_v17 = vld [vmem:[#allocation2] sm:$0xff] }
  0x39   :  { %v77_v18 = vld [vmem:[%s1636_s0] sm:$0xf]  ;;  %v187_v19 = vpack.c.bf16 %v1401_v17, %v1401_v17  ;;  %v1422_v21 = vld [vmem:[#allocation5 + $0xb0] sm:$0xff]   ;;  %v1426_v22 = vld [vmem:[#allocation5 + $0xa8] sm:$0xff]  }
  0x3a   :  { %947 = vmatpush3.bf16.msra.mxu0 %v1155_v3  ;;  %967 = vmatpush3.bf16.msra.mxu1 %v1371_v4  ;;  %v1411_v20 = vld [vmem:[#allocation5 + $0xb8] sm:$0xff]   ;;  %v1430_v23 = vld [vmem:[#allocation5 + $0xa0] sm:$0xff]   ;;  %v1438_v25 = vld [vmem:[#allocation5 + $0x90] sm:$0xff]  }
  0x3b   :  { %948 = vmatprep.subr.bf16.mxu0 %v1311_v0  ;;  %968 = vmatprep.subr.bf16.mxu1 %v1311_v0  ;;  %v1434_v24 = vld [vmem:[#allocation5 + $0x98] sm:$0xff]   ;;  %v1442_v26 = vld [vmem:[#allocation5 + $0x88] sm:$0xff]   ;;  %v1446_v27 = vld [vmem:[#allocation5 + $0x80] sm:$0xff]  }
  0x3c   :  { %v1453_v28 = vld [vmem:[%s1639_s3 + $0x38] sm:$0xff]   ;;  %v1459_v29 = vld [vmem:[%s1639_s3 + $0x30] sm:$0xff]   ;;  %v813_v30 = vld [vmem:[#allocation7] ss:$0 sm:$0xff] }
  0x3d   :  { %v1488_v47 = vld [vmem:[%s1639_s3 + $0x28] sm:$0xff]   ;;  %v1495_v48 = vld [vmem:[%s1639_s3 + $0x20] sm:$0xff]   ;;  %v1502_v49 = vld [vmem:[%s1639_s3 + $0x18] sm:$0xff]  }
  0x3e   :  { %949 = vmatpush3.bf16.msra.mxu0 %v1157_v5  ;;  %969 = vmatpush3.bf16.msra.mxu1 %v1376_v6  ;;  %v1509_v50 = vld [vmem:[%s1639_s3 + $0x10] sm:$0xff]   ;;  %v1516_v51 = vld [vmem:[%s1639_s3 + $0x8] sm:$0xff]   ;;  %v1523_v52 = vld [vmem:[%s1639_s3] sm:$0xff]   ;;  %s1313_s3 = smov [#allocation10]  }
  0x3f   :  { %950 = vmatprep.subr.bf16.mxu0 %v1311_v0  ;;  %970 = vmatprep.subr.bf16.mxu1 %v1311_v0  ;;  %v1527_v53 = vld [vmem:[#allocation7 + $0x1] ss:$0 sm:$0xff]  ;;  %v1548_v3 = vld [vmem:[#allocation8] ss:$0 sm:$0xff]  ;;  %s802_s8 = sshll.u32 %s1313_s3, 4  ;;  %s803_s8 = int_to_ptr.vmem [resolvable:$true] %s802_s8 }
  0x40   :  { %s1277_s9 = scalar_lea.vmem %s803_s8, 128  ;;  %p1282_p7 = scmp.lt.s32.totalorder %s803_s8, %s803_s8 }
  0x41   :  { %p1278_p6 = scmp.ne.s32.totalorder %s803_s8, %s1277_s9  ;;  %p1283_p8 = scmp.lt.s32.totalorder %s1277_s9, %s1277_s9 }
  0x42   :  { %951 = vmatpush3.bf16.msra.mxu0 %v1159_v7  ;;  %971 = vmatpush3.bf16.msra.mxu1 %v1381_v8 }
  0x43   :  { %952 = vmatprep.subr.bf16.mxu0 %v1311_v0  ;;  %972 = vmatprep.subr.bf16.mxu1 %v1311_v0  ;;  %p1284_p9 = por %p1283_p8, %p1282_p7 }
  0x45   :  { %p1285_p10 = pnand %p1284_p9, %p1278_p6 }
  0x46   :  { %953 = vmatpush3.bf16.msra.mxu0 %v1161_v9  ;;  %973 = vmatpush3.bf16.msra.mxu1 %v1386_v10 }
  0x47   :  { %954 = vmatprep.subr.bf16.mxu0 %v1311_v0  ;;  %974 = vmatprep.subr.bf16.mxu1 %v1311_v0 }
  0x4a   :  { %955 = vmatpush3.bf16.msra.mxu0 %v1163_v11  ;;  %975 = vmatpush3.bf16.msra.mxu1 %v1389_v12 }
  0x4b   :  { %956 = vmatprep.subr.bf16.mxu0 %v1311_v0  ;;  %976 = vmatprep.subr.bf16.mxu1 %v1311_v0 }
  0x4e   :  { %957 = vmatpush3.bf16.msra.mxu0 %v1165_v13  ;;  %977 = vmatpush3.bf16.msra.mxu1 %v1394_v14 }
  0x4f   :  { %958 = vmatprep.subr.bf16.mxu0 %v1311_v0  ;;  %978 = vmatprep.subr.bf16.mxu1 %v1311_v0 }
  0x52   :  { %959 = vmatpush3.bf16.msra.mxu0 %v1167_v15  ;;  %979 = vmatpush3.bf16.msra.mxu1 %v1399_v16 }
  0x53   :  { %984 = vmatprep.subr.bf16.mxu0 %v1311_v0  ;;  %1004 = vmatprep.subr.bf16.mxu1 %v1311_v0 }
  0x55   :  { %961 = vmatmul.mubr.bf16.vlgmr.msra.gmra.mxu0 %v77_v18  ;;  %981 = vmatmul.mubr.bf16.vlgmr.msra.gmra.mxu1 %v187_v19 }
  0x56   :  { %985 = vmatpush3.bf16.msra.mxu0 %v1411_v20  ;;  %1000 = vmatprep.mubr.msk.bf16.mxu0 %vm1312_vm0, %v1311_v0 }
  0x57   :  { %986 = vmatprep.subr.bf16.mxu0 %v1311_v0  ;;  %1020 = vmatprep.mubr.msk.bf16.mxu1 %vm1312_vm0, %v1311_v0 }
  0x58   :  { %1005 = vmatpush3.bf16.msra.mxu1 %v1453_v28 }
  0x59   :  { %1006 = vmatprep.subr.bf16.mxu1 %v1311_v0 }
  0x5a   :  { %987 = vmatpush3.bf16.msra.mxu0 %v1422_v21 }
  0x5b   :  { %988 = vmatprep.subr.bf16.mxu0 %v1311_v0 }
  0x5c   :  { %1007 = vmatpush3.bf16.msra.mxu1 %v1459_v29 }
  0x5d   :  { %1008 = vmatprep.subr.bf16.mxu1 %v1311_v0 }
  0x5e   :  { %989 = vmatpush3.bf16.msra.mxu0 %v1426_v22 }
  0x5f   :  { %990 = vmatprep.subr.bf16.mxu0 %v1311_v0 }
  0x60   :  { %1009 = vmatpush3.bf16.msra.mxu1 %v1488_v47 }
  0x61   :  { %1010 = vmatprep.subr.bf16.mxu1 %v1311_v0 }
  0x62   :  { %991 = vmatpush3.bf16.msra.mxu0 %v1430_v23 }
  0x63   :  { %992 = vmatprep.subr.bf16.mxu0 %v1311_v0 }
  0x64   :  { %1011 = vmatpush3.bf16.msra.mxu1 %v1495_v48 }
  0x65   :  { %1012 = vmatprep.subr.bf16.mxu1 %v1311_v0 }
  0x66   :  { %993 = vmatpush3.bf16.msra.mxu0 %v1434_v24 }
  0x67   :  { %994 = vmatprep.subr.bf16.mxu0 %v1311_v0 }
  0x68   :  { %1013 = vmatpush3.bf16.msra.mxu1 %v1502_v49 }
  0x69   :  { %1014 = vmatprep.subr.bf16.mxu1 %v1311_v0 }
  0x6a   :  { %995 = vmatpush3.bf16.msra.mxu0 %v1438_v25 }
  0x6b   :  { %996 = vmatprep.subr.bf16.mxu0 %v1311_v0 }
  0x6c   :  { %1015 = vmatpush3.bf16.msra.mxu1 %v1509_v50 }
  0x6d   :  { %1016 = vmatprep.subr.bf16.mxu1 %v1311_v0 }
  0x6e   :  { %997 = vmatpush3.bf16.msra.mxu0 %v1442_v26 }
  0x6f   :  { %998 = vmatprep.subr.bf16.mxu0 %v1311_v0 }
  0x70   :  { %1017 = vmatpush3.bf16.msra.mxu1 %v1516_v51 }
  0x71   :  { %1018 = vmatprep.subr.bf16.mxu1 %v1311_v0 }
  0x72   :  { %999 = vmatpush3.bf16.msra.mxu0 %v1446_v27 }
  0x73   :  { %1024 = vmatprep.subr.bf16.mxu0 %v1311_v0 }
  0x74   :  { %1019 = vmatpush3.bf16.msra.mxu1 %v1523_v52 }
  0x75   :  { %1044 = vmatprep.subr.bf16.mxu1 %v1311_v0 }
 0x115   :  { %v181_v31 = vpop.f32.mrf.mxu0  ;;  %v286_v33 = vpop.f32.mrf.mxu1 }
 0x116   :  { %v1464_v32 = vadd.f32 %v813_v30, %v181_v31 }
 0x117   :  { %v962_v34 = vpop.f32.mrf.mxu0  ;;  %v982_v36 = vpop.f32.mrf.mxu1 }
 0x118   :  { %v287_v35 = vadd.f32 %v286_v33, %v1464_v32 }
 0x119   :  { %v184_v37 = vpop.f32.mrf.mxu0  ;;  %v289_v39 = vpop.f32.mrf.mxu1 }
 0x11a   :  { %v293_v38 = vmin.f32 %v287_v35, 0.0  ;;  %vm292_vm1 = vcmp.gt.f32.partialorder %v287_v35, 0.0 }
 0x11b   :  { %v963_v40 = vpop.f32.mrf.mxu0  ;;  %v983_v42 = vpop.f32.mrf.mxu1 }
 0x11c   :  { %v294_v41 = vmul.f32 1.442695, %v293_v38 }
 0x11e   :  { %1185 = vpow2.f32 %v294_v41 }
 0x12b   :  { %v1186_v43 = vpop.eup %1185 }
 0x12c   :  { %v830_v44 = vadd.f32 -1.0, %v1186_v43 }
 0x12e   :  { %v297_v45 = vsel %vm292_vm1, %v287_v35, %v830_v44 }
 0x12f   :  { %v298_v46 = vpack.c.bf16 %v297_v45, %v297_v45 }
 0x131   :  { %1001 = vmatmul.mubr.bf16.vlgmr.msra.gmra.mxu0 %v298_v46 }
 0x132   :  { %1025 = vmatpush3.bf16.msra.mxu0 %v1367_v2  ;;  %1040 = vmatprep.mubr.msk.bf16.mxu0 %vm1312_vm0, %v1311_v0 }
 0x133   :  { %1026 = vmatprep.subr.bf16.mxu0 %v1311_v0 }
 0x136   :  { %1027 = vmatpush3.bf16.msra.mxu0 %v1371_v4 }
 0x137   :  { %1028 = vmatprep.subr.bf16.mxu0 %v1311_v0 }
 0x13a   :  { %1029 = vmatpush3.bf16.msra.mxu0 %v1376_v6 }
 0x13b   :  { %1030 = vmatprep.subr.bf16.mxu0 %v1311_v0 }
 0x13e   :  { %1031 = vmatpush3.bf16.msra.mxu0 %v1381_v8 }
 0x13f   :  { %1032 = vmatprep.subr.bf16.mxu0 %v1311_v0 }
 0x142   :  { %1033 = vmatpush3.bf16.msra.mxu0 %v1386_v10 }
 0x143   :  { %1034 = vmatprep.subr.bf16.mxu0 %v1311_v0 }
 0x146   :  { %1035 = vmatpush3.bf16.msra.mxu0 %v1389_v12 }
 0x147   :  { %1036 = vmatprep.subr.bf16.mxu0 %v1311_v0 }
 0x14a   :  { %1037 = vmatpush3.bf16.msra.mxu0 %v1394_v14 }
 0x14b   :  { %1038 = vmatprep.subr.bf16.mxu0 %v1311_v0 }
 0x14e   :  { %1039 = vmatpush3.bf16.msra.mxu0 %v1399_v16 }
 0x14f   :  { %1064 = vmatprep.subr.bf16.mxu0 %v1311_v0 }
 0x1f1   :  { %v401_v54 = vpop.f32.mrf.mxu0 }
 0x1f2   :  { %v402_v55 = vadd.f32 %v1527_v53, %v401_v54 }
 0x1f3   :  { %v1002_v56 = vpop.f32.mrf.mxu0 }
 0x1f4   :  { %v408_v57 = vmin.f32 %v402_v55, 0.0  ;;  %vm407_vm2 = vcmp.gt.f32.partialorder %v402_v55, 0.0 }
 0x1f5   :  { %v404_v58 = vpop.f32.mrf.mxu0 }
 0x1f6   :  { %v409_v59 = vmul.f32 1.442695, %v408_v57 }
 0x1f7   :  { %v1003_v60 = vpop.f32.mrf.mxu0 }
 0x1f8   :  { %1187 = vpow2.f32 %v409_v59 }
 0x205   :  { %v1188_v61 = vpop.eup %1187 }
 0x206   :  { %v840_v62 = vadd.f32 -1.0, %v1188_v61 }
 0x208   :  { %v412_v63 = vsel %vm407_vm2, %v402_v55, %v840_v62 }
 0x209   :  { %v413_v1 = vpack.c.bf16 %v412_v63, %v412_v63 }
 0x20b   :  { %1021 = vmatmul.mubr.bf16.vlgmr.msra.gmra.mxu1 %v413_v1 }
 0x20c   :  { %1045 = vmatpush3.bf16.msra.mxu1 %v1411_v20  ;;  %1060 = vmatprep.mubr.msk.bf16.mxu1 %vm1312_vm0, %v1311_v0 }
 0x20d   :  { %1046 = vmatprep.subr.bf16.mxu1 %v1311_v0 }
 0x210   :  { %1047 = vmatpush3.bf16.msra.mxu1 %v1422_v21 }
 0x211   :  { %1048 = vmatprep.subr.bf16.mxu1 %v1311_v0 }
 0x214   :  { %1049 = vmatpush3.bf16.msra.mxu1 %v1426_v22 }
 0x215   :  { %1050 = vmatprep.subr.bf16.mxu1 %v1311_v0 }
 0x218   :  { %1051 = vmatpush3.bf16.msra.mxu1 %v1430_v23 }
 0x219   :  { %1052 = vmatprep.subr.bf16.mxu1 %v1311_v0 }
 0x21c   :  { %1053 = vmatpush3.bf16.msra.mxu1 %v1434_v24 }
 0x21d   :  { %1054 = vmatprep.subr.bf16.mxu1 %v1311_v0 }
 0x220   :  { %1055 = vmatpush3.bf16.msra.mxu1 %v1438_v25 }
 0x221   :  { %1056 = vmatprep.subr.bf16.mxu1 %v1311_v0 }
 0x224   :  { %1057 = vmatpush3.bf16.msra.mxu1 %v1442_v26 }
 0x225   :  { %1058 = vmatprep.subr.bf16.mxu1 %v1311_v0 }
 0x228   :  { %1059 = vmatpush3.bf16.msra.mxu1 %v1446_v27 }
 0x229   :  { %1084 = vmatprep.subr.bf16.mxu1 %v1311_v0 }
 0x2cb   :  { %v516_v5 = vpop.f32.mrf.mxu1 }
 0x2cc   :  { %v517_v7 = vadd.f32 %v1548_v3, %v516_v5 }
 0x2cd   :  { %v1022_v9 = vpop.f32.mrf.mxu1 }
 0x2ce   :  { %v1552_v11 = vadd.f32 %v517_v7, %v1401_v17 }
 0x2cf   :  { %v519_v13 = vpop.f32.mrf.mxu1 }
 0x2d0   :  { %v523_v15 = vpack.c.bf16 %v1552_v11, %v1552_v11 }
 0x2d1   :  { %v1023_v18 = vpop.f32.mrf.mxu1 }
 0x2d2   :  { %1041 = vmatmul.mubr.bf16.vlgmr.msra.gmra.mxu0 %v523_v15 }
 0x2d3   :  { %1065 = vmatpush3.bf16.msra.mxu0 %v1453_v28  ;;  %1080 = vmatprep.mubr.msk.bf16.mxu0 %vm1312_vm0, %v1311_v0 }
 0x2d4   :  { %1066 = vmatprep.subr.bf16.mxu0 %v1311_v0 }
 0x2d7   :  { %1067 = vmatpush3.bf16.msra.mxu0 %v1459_v29 }
 0x2d8   :  { %1068 = vmatprep.subr.bf16.mxu0 %v1311_v0 }
 0x2db   :  { %1069 = vmatpush3.bf16.msra.mxu0 %v1488_v47 }
 0x2dc   :  { %1070 = vmatprep.subr.bf16.mxu0 %v1311_v0 }
 0x2df   :  { %1071 = vmatpush3.bf16.msra.mxu0 %v1495_v48 }
 0x2e0   :  { %1072 = vmatprep.subr.bf16.mxu0 %v1311_v0 }
 0x2e3   :  { %1073 = vmatpush3.bf16.msra.mxu0 %v1502_v49 }
 0x2e4   :  { %1074 = vmatprep.subr.bf16.mxu0 %v1311_v0 }
 0x2e7   :  { %1075 = vmatpush3.bf16.msra.mxu0 %v1509_v50 }
 0x2e8   :  { %1076 = vmatprep.subr.bf16.mxu0 %v1311_v0 }
 0x2eb   :  { %1077 = vmatpush3.bf16.msra.mxu0 %v1516_v51 }
 0x2ec   :  { %1078 = vmatprep.subr.bf16.mxu0 %v1311_v0 }
 0x2ef   :  { %1079 = vmatpush3.bf16.msra.mxu0 %v1523_v52 }
 0x2f0   :  { %1104 = vmatprep.subr.bf16.mxu0 %v1311_v0 }
 0x392   :  { %v558_v17 = vpop.f32.mrf.mxu0 }
 0x393   :  { %v559_v19 = vadd.f32 %v558_v17, %v1464_v32 }
 0x394   :  { %v1042_v30 = vpop.f32.mrf.mxu0 }
 0x395   :  { %v565_v31 = vmin.f32 %v559_v19, 0.0  ;;  %vm564_vm3 = vcmp.gt.f32.partialorder %v559_v19, 0.0 }
 0x396   :  { %v561_v33 = vpop.f32.mrf.mxu0 }
 0x397   :  { %v566_v34 = vmul.f32 1.442695, %v565_v31 }
 0x398   :  { %v1043_v35 = vpop.f32.mrf.mxu0 }
 0x399   :  { %1189 = vpow2.f32 %v566_v34 }
 0x3a6   :  { %v1190_v36 = vpop.eup %1189 }
 0x3a7   :  { %v850_v37 = vadd.f32 -1.0, %v1190_v36 }
 0x3a9   :  { %v569_v38 = vsel %vm564_vm3, %v559_v19, %v850_v37 }
 0x3aa   :  { %v570_v39 = vpack.c.bf16 %v569_v38, %v569_v38 }
 0x3ac   :  { %1061 = vmatmul.mubr.bf16.vlgmr.msra.gmra.mxu1 %v570_v39 }
 0x3ad   :  { %1085 = vmatpush3.bf16.msra.mxu1 %v1367_v2  ;;  %1100 = vmatprep.mubr.msk.bf16.mxu1 %vm1312_vm0, %v1311_v0 }
 0x3ae   :  { %1086 = vmatprep.subr.bf16.mxu1 %v1311_v0 }
 0x3b1   :  { %1087 = vmatpush3.bf16.msra.mxu1 %v1371_v4 }
 0x3b2   :  { %1088 = vmatprep.subr.bf16.mxu1 %v1311_v0 }
 0x3b5   :  { %1089 = vmatpush3.bf16.msra.mxu1 %v1376_v6 }
 0x3b6   :  { %1090 = vmatprep.subr.bf16.mxu1 %v1311_v0 }
 0x3b9   :  { %1091 = vmatpush3.bf16.msra.mxu1 %v1381_v8 }
 0x3ba   :  { %1092 = vmatprep.subr.bf16.mxu1 %v1311_v0 }
 0x3bd   :  { %1093 = vmatpush3.bf16.msra.mxu1 %v1386_v10 }
 0x3be   :  { %1094 = vmatprep.subr.bf16.mxu1 %v1311_v0 }
 0x3c1   :  { %1095 = vmatpush3.bf16.msra.mxu1 %v1389_v12 }
 0x3c2   :  { %1096 = vmatprep.subr.bf16.mxu1 %v1311_v0 }
 0x3c5   :  { %1097 = vmatpush3.bf16.msra.mxu1 %v1394_v14 }
 0x3c6   :  { %1098 = vmatprep.subr.bf16.mxu1 %v1311_v0 }
 0x3c9   :  { %1099 = vmatpush3.bf16.msra.mxu1 %v1399_v16 }
 0x3ca   :  { %1124 = vmatprep.subr.bf16.mxu1 %v1311_v0 }
 0x46c   :  { %v605_v2 = vpop.f32.mrf.mxu1 }
 0x46d   :  { %v606_v4 = vadd.f32 %v1527_v53, %v605_v2 }
 0x46e   :  { %v1062_v6 = vpop.f32.mrf.mxu1 }
 0x46f   :  { %v612_v8 = vmin.f32 %v606_v4, 0.0  ;;  %vm611_vm4 = vcmp.gt.f32.partialorder %v606_v4, 0.0 }
 0x470   :  { %v608_v10 = vpop.f32.mrf.mxu1 }
 0x471   :  { %v613_v40 = vmul.f32 1.442695, %v612_v8 }
 0x472   :  { %v1063_v41 = vpop.f32.mrf.mxu1 }
 0x473   :  { %1191 = vpow2.f32 %v613_v40 }
 0x480   :  { %v1192_v12 = vpop.eup %1191 }
 0x481   :  { %v851_v42 = vadd.f32 -1.0, %v1192_v12 }
 0x483   :  { %v616_v43 = vsel %vm611_vm4, %v606_v4, %v851_v42 }
 0x484   :  { %v617_v14 = vpack.c.bf16 %v616_v43, %v616_v43 }
 0x486   :  { %1081 = vmatmul.mubr.bf16.vlgmr.msra.gmra.mxu0 %v617_v14 }
 0x487   :  { %1105 = vmatpush3.bf16.msra.mxu0 %v1411_v20  ;;  %1120 = vmatprep.mubr.msk.bf16.mxu0 %vm1312_vm0, %v1311_v0 }
 0x488   :  { %1106 = vmatprep.subr.bf16.mxu0 %v1311_v0 }
 0x48b   :  { %1107 = vmatpush3.bf16.msra.mxu0 %v1422_v21 }
 0x48c   :  { %1108 = vmatprep.subr.bf16.mxu0 %v1311_v0 }
 0x48f   :  { %1109 = vmatpush3.bf16.msra.mxu0 %v1426_v22 }
 0x490   :  { %1110 = vmatprep.subr.bf16.mxu0 %v1311_v0 }
 0x493   :  { %1111 = vmatpush3.bf16.msra.mxu0 %v1430_v23 }
 0x494   :  { %1112 = vmatprep.subr.bf16.mxu0 %v1311_v0 }
 0x497   :  { %1113 = vmatpush3.bf16.msra.mxu0 %v1434_v24 }
 0x498   :  { %1114 = vmatprep.subr.bf16.mxu0 %v1311_v0 }
 0x49b   :  { %1115 = vmatpush3.bf16.msra.mxu0 %v1438_v25 }
 0x49c   :  { %1116 = vmatprep.subr.bf16.mxu0 %v1311_v0 }
 0x49f   :  { %1117 = vmatpush3.bf16.msra.mxu0 %v1442_v26 }
 0x4a0   :  { %1118 = vmatprep.subr.bf16.mxu0 %v1311_v0 }
 0x4a3   :  { %1119 = vmatpush3.bf16.msra.mxu0 %v1446_v27 }
 0x546   :  { %v652_v16 = vpop.f32.mrf.mxu0 }
 0x547   :  { %v653_v20 = vadd.f32 %v1548_v3, %v652_v16 }
 0x548   :  { %v1082_v21 = vpop.f32.mrf.mxu0 }
 0x549   :  { %v658_v22 = vadd.f32 %v653_v20, %v1552_v11 }
 0x54a   :  { %v655_v23 = vpop.f32.mrf.mxu0 }
 0x54b   :  { %v659_v24 = vpack.c.bf16 %v658_v22, %v658_v22 }
 0x54c   :  { %v1083_v44 = vpop.f32.mrf.mxu0 }
 0x54d   :  { %1101 = vmatmul.mubr.bf16.vlgmr.msra.gmra.mxu1 %v659_v24 }
 0x54e   :  { %1125 = vmatpush3.bf16.msra.mxu1 %v1453_v28  ;;  %1140 = vmatprep.mubr.msk.bf16.mxu1 %vm1312_vm0, %v1311_v0 }
 0x54f   :  { %1126 = vmatprep.subr.bf16.mxu1 %v1311_v0 }
 0x552   :  { %1127 = vmatpush3.bf16.msra.mxu1 %v1459_v29 }
 0x553   :  { %1128 = vmatprep.subr.bf16.mxu1 %v1311_v0 }
 0x556   :  { %1129 = vmatpush3.bf16.msra.mxu1 %v1488_v47 }
 0x557   :  { %1130 = vmatprep.subr.bf16.mxu1 %v1311_v0 }
 0x55a   :  { %1131 = vmatpush3.bf16.msra.mxu1 %v1495_v48 }
 0x55b   :  { %1132 = vmatprep.subr.bf16.mxu1 %v1311_v0 }
 0x55e   :  { %1133 = vmatpush3.bf16.msra.mxu1 %v1502_v49 }
 0x55f   :  { %1134 = vmatprep.subr.bf16.mxu1 %v1311_v0 }
 0x562   :  { %1135 = vmatpush3.bf16.msra.mxu1 %v1509_v50 }
 0x563   :  { %1136 = vmatprep.subr.bf16.mxu1 %v1311_v0 }
 0x566   :  { %1137 = vmatpush3.bf16.msra.mxu1 %v1516_v51 }
 0x567   :  { %1138 = vmatprep.subr.bf16.mxu1 %v1311_v0 }
 0x56a   :  { %1139 = vmatpush3.bf16.msra.mxu1 %v1523_v52 }
 0x60d   :  { %v694_v25 = vpop.f32.mrf.mxu1 }
 0x60e   :  { %v695_v26 = vadd.f32 %v694_v25, %v1464_v32 }
 0x60f   :  { %v1102_v27 = vpop.f32.mrf.mxu1 }
 0x610   :  { %v701_v28 = vmin.f32 %v695_v26, 0.0  ;;  %vm700_vm5 = vcmp.gt.f32.partialorder %v695_v26, 0.0 }
 0x611   :  { %v697_v29 = vpop.f32.mrf.mxu1 }
 0x612   :  { %v702_v45 = vmul.f32 1.442695, %v701_v28 }
 0x613   :  { %v1103_v46 = vpop.f32.mrf.mxu1 }
 0x614   :  { %1193 = vpow2.f32 %v702_v45 }
 0x621   :  { %v1194_v47 = vpop.eup %1193 }
 0x622   :  { %v852_v48 = vadd.f32 -1.0, %v1194_v47 }
 0x624   :  { %v705_v49 = vsel %vm700_vm5, %v695_v26, %v852_v48 }
 0x625   :  { %v706_v50 = vpack.c.bf16 %v705_v49, %v705_v49 }
 0x627   :  { %1121 = vmatmul.mubr.bf16.vlgmr.msra.gmra.mxu0 %v706_v50 }
 0x6e7   :  { %v741_v51 = vpop.f32.mrf.mxu0 }
 0x6e8   :  { %v742_v0 = vadd.f32 %v1527_v53, %v741_v51 }
 0x6e9   :  { %v1122_v54 = vpop.f32.mrf.mxu0 }
 0x6ea   :  { %v748_v52 = vmin.f32 %v742_v0, 0.0  ;;  %vm747_vm6 = vcmp.gt.f32.partialorder %v742_v0, 0.0 }
 0x6eb   :  { %v744_v55 = vpop.f32.mrf.mxu0 }
 0x6ec   :  { %v749_v56 = vmul.f32 1.442695, %v748_v52 }
 0x6ed   :  { %v1123_v32 = vpop.f32.mrf.mxu0 }
 0x6ee   :  { %1195 = vpow2.f32 %v749_v56 }
 0x6fb   :  { %v1196_v57 = vpop.eup %1195 }
 0x6fc   :  { %v853_v58 = vadd.f32 -1.0, %v1196_v57 }
 0x6fe   :  { %v752_v59 = vsel %vm747_vm6, %v742_v0, %v853_v58 }
 0x6ff   :  { %v753_v60 = vpack.c.bf16 %v752_v59, %v752_v59 }
 0x701   :  { %1141 = vmatmul.mubr.bf16.vlgmr.msra.gmra.mxu1 %v753_v60 }
 0x7c1   :  { %v788_v61 = vpop.f32.mrf.mxu1 }
 0x7c2   :  { %v789_v62 = vadd.f32 %v1548_v3, %v788_v61 }
 0x7c3   :  { %v1142_v63 = vpop.f32.mrf.mxu1 }
 0x7c4   :  { %v794_v1 = vadd.f32 %v789_v62, %v658_v22 }
 0x7c5   :  { %v791_v53 = vpop.f32.mrf.mxu1 }
 0x7c6   :  { %795 = vst [vmem:[#allocation10] sm:$0xff] %v794_v1 }
 0x7c7   :  { %v1143_v5 = vpop.f32.mrf.mxu1 }
 0x7c8   :  { %1288 = shalt.err (!%p1285_p10)
}
 0x7c9   :  { %805 = dma.vmem_to_hbm [thread:$0]  %s803_s8, 128, %s1642_s6, [#allocation4]  }
 0x7ca   :  { %1303 = dma.done.wait [#allocation4], 128  }
 0x7cb   :  { %1304 = vsyncadd [#allocation4], 4294967168 }
 0x7cc   :  { %809 = vsyncpa [#allocation3], 1 }
 0x7cd   :  { %810 = vsyncpa [#allocation6], 1 }
 0x7ce   :  { %811 = vsyncpa [#allocation9], 1 }
 0x7cf   :  { %812 = vsyncpa [#allocation4], 1 }

</bundles_post_ra>
